<compile_context>
chip_gen: v7x
topology: tpu7x:2x2x1
jax: 0.10.0
libtpu: 0.0.40
codegen_flags: <defaults>
</compile_context>

<pallas_src>
import jax
import jax.numpy as jnp
from jax.experimental import pallas as pl
from jax.experimental.pallas import tpu as pltpu


# --- tuning constants (production defaults) ---------------------------------
TARGET_CHUNK_BYTES = 4 << 20      # aim for >= 4 MiB per DMA chunk
SMALL_BYPASS_BYTES = 512 << 10    # below this, skip the Pallas launch entirely


def _default_max_chunks():
    """Chip-aware cap on the number of overlapped DMA chunks."""
    try:
        kind = jax.devices()[0].device_kind.lower()
    except Exception:  # pragma: no cover - defensive
        return 8
    if "v7" in kind:
        return 16          # more engines help toward 3.2 TB/s on huge copies
    if "v5 lite" in kind or "v5e" in kind or "v5lite" in kind:
        return 4           # ~820 GB/s saturates early; cut descriptor overhead
    return 8               # v6e / default


def _plan_chunks(rows, total_bytes, max_chunks, target_chunk_bytes):
    """Static chunk plan along dim 0 of the collapsed view.

    Returns None (single whole-array DMA) or a tuple of (start_row, num_rows).
    Chunk count is derived from total bytes so every chunk stays in the
    bandwidth-bound regime (>= target_chunk_bytes).
    """
    n = int(max(1, min(max_chunks, total_bytes // max(1, target_chunk_bytes), rows)))
    if n <= 1:
        return None
    bounds = [(i * rows) // n for i in range(n + 1)]
    chunks = tuple(
        (b0, b1 - b0) for b0, b1 in zip(bounds[:-1], bounds[1:]) if b1 > b0
    )
    return chunks if len(chunks) > 1 else None


def _make_dma_copy_kernel(chunks):
    """Kernel factory: whole-array or chunked HBM->HBM async copies."""

    def kernel(x_hbm, o_hbm, sem):
        if chunks is None:
            cp = pltpu.make_async_copy(x_hbm, o_hbm, sem.at[0])
            cp.start()
            cp.wait()
            return
        cps = []
        for i, (start, size) in enumerate(chunks):
            cp = pltpu.make_async_copy(
                x_hbm.at[pl.ds(start, size)],
                o_hbm.at[pl.ds(start, size)],
                sem.at[i],
            )
            # Issue all DMAs first so they overlap across engines.
            # (Optionally cp.start(priority=1) to run as background traffic
            # when concurrent with latency-critical compute kernels.)
            cp.start()
            cps.append(cp)
        for cp in cps:
            cp.wait()

    return kernel


def _pallas_materialize(src, *, max_chunks=None,
                        target_chunk_bytes=TARGET_CHUNK_BYTES,
                        small_bypass_bytes=SMALL_BYPASS_BYTES):
    """Exact copy of `src` into a fresh buffer (bit-exact, NaNs preserved)."""
    total_bytes = src.size * src.dtype.itemsize

    # Small-tensor / empty-tensor bypass: a Mosaic launch costs more than the
    # copy itself; a plain XLA copy still yields a fresh buffer.
    if src.size == 0 or total_bytes < small_bypass_bytes:
        return jnp.copy(src)

    if max_chunks is None:
        max_chunks = _default_max_chunks()

    # Collapse leading dims so chunking is driven by bytes, not by a possibly
    # tiny batch dim.  Reshape of a contiguous array is free at the XLA level.
    flat = src.reshape((-1, src.shape[-1])) if src.ndim >= 2 else src
    rows = flat.shape[0] if flat.ndim >= 1 else 1

    chunks = _plan_chunks(rows, total_bytes, max_chunks, target_chunk_bytes)
    n_sems = 1 if chunks is None else len(chunks)

    out = pl.pallas_call(
        _make_dma_copy_kernel(chunks),
        out_shape=jax.ShapeDtypeStruct(flat.shape, flat.dtype),
        in_specs=[pl.BlockSpec(memory_space=pl.ANY)],   # raw HBM ref, no auto-DMA
        out_specs=pl.BlockSpec(memory_space=pl.ANY),
        scratch_shapes=[pltpu.SemaphoreType.DMA((n_sems,))],
        cost_estimate=pl.CostEstimate(
            flops=0, transcendentals=0, bytes_accessed=2 * total_bytes),
    )(flat)
    return out.reshape(src.shape)


def embedder_placeholder_forward(x=None, inputs_embeds=None, *args,
                                 materialize=False, **kwargs):
    """JAX/Pallas equivalent of embedder_placeholder.forward.

    Returns `x` if it is not None, otherwise `inputs_embeds`.  The default
    path performs no data movement at all.  With materialize=True an identical
    fresh buffer is produced (small tensors via XLA copy, large tensors via
    the Pallas HBM->HBM multi-DMA copy kernel).
    """
    src = x if x is not None else inputs_embeds
    if src is None:
        return None
    if not materialize:
        return src  # fastest possible: identity pass-through, zero HBM traffic
    allowed = ("max_chunks", "target_chunk_bytes", "small_bypass_bytes")
    copy_kwargs = {k: kwargs[k] for k in allowed if k in kwargs}
    return _pallas_materialize(src, **copy_kwargs)


if __name__ == "__main__":
    key = jax.random.PRNGKey(0)
    k1, k2, k3, k4 = jax.random.split(key, 4)

    # Case 1: `x` provided (batch=2, seq=8, hidden=32) -> pure pass-through.
    x = jax.random.normal(k1, (2, 8, 32), dtype=jnp.float32)
    out_x = embedder_placeholder_forward(x=x)
    jax.block_until_ready(out_x)
    assert out_x is x  # same array, no copy (eager-mode identity)

    # Case 2: `x` is None, `inputs_embeds` provided -> pass-through.
    inputs_embeds = jax.random.normal(k2, (2, 8, 32), dtype=jnp.float32)
    out_e = embedder_placeholder_forward(x=None, inputs_embeds=inputs_embeds)
    jax.block_until_ready(out_e)
    assert out_e is inputs_embeds

    # Case 3: materialize a tiny tensor -> small-tensor bypass (XLA copy, no
    # Pallas launch), still a fresh identical buffer.
    out_m = embedder_placeholder_forward(x=x, materialize=True)
    jax.block_until_ready(out_m)
    assert out_m.shape == x.shape and out_m.dtype == x.dtype
    assert bool(jnp.array_equal(out_m, x))

    # Case 4: force the Pallas single whole-array HBM->HBM DMA path
    # (2*128*256 f32 = 256 KiB, bypass disabled for the test).
    mid = jax.random.normal(k3, (2, 128, 256), dtype=jnp.float32)
    out_mid = embedder_placeholder_forward(
        inputs_embeds=mid, materialize=True, small_bypass_bytes=0)
    jax.block_until_ready(out_mid)
    assert out_mid.shape == mid.shape and out_mid.dtype == mid.dtype
    assert bool(jnp.array_equal(out_mid, mid))

    # Case 5: force the chunked multi-DMA path (4*256*256 f32 = 1 MiB, test
    # chunk target 256 KiB -> 4 overlapped DMAs over the collapsed rows).
    big = jax.random.normal(k4, (4, 256, 256), dtype=jnp.float32)
    out_b = embedder_placeholder_forward(
        inputs_embeds=big, materialize=True,
        small_bypass_bytes=0, target_chunk_bytes=256 << 10)
    jax.block_until_ready(out_b)
    assert out_b.shape == big.shape and out_b.dtype == big.dtype
    assert bool(jnp.array_equal(out_b, big))

    print("KERNEL_OK")
</pallas_src>

<mosaic_0001>
module attributes {stable_mosaic.version = 11 : i64} {
  func.func @kernel(%arg0: memref<256x256xf32, #tpu.memory_space<any>>, %arg1: memref<256x256xf32, #tpu.memory_space<any>>, %arg2: memref<1x!tpu.dma_semaphore, #tpu.memory_space<semaphore_mem>>) attributes {dimension_semantics = [], scalar_prefetch = 0 : i64, scratch_operands = 1 : i64, tpu.core_type = #tpu.core_type<tc>} {
    %c0_i32 = arith.constant 0 : i32
    %0 = tpu.memref_slice %arg2[%c0_i32] : memref<1x!tpu.dma_semaphore, #tpu.memory_space<semaphore_mem>> -> memref<1x!tpu.dma_semaphore, #tpu.memory_space<semaphore_mem>>
    %1 = tpu.memref_squeeze %0 : memref<1x!tpu.dma_semaphore, #tpu.memory_space<semaphore_mem>> -> memref<!tpu.dma_semaphore, #tpu.memory_space<semaphore_mem>>
    tpu.enqueue_dma source(%arg0 : memref<256x256xf32, #tpu.memory_space<any>>) target(%arg1 : memref<256x256xf32, #tpu.memory_space<any>>) target_semaphore(%1 : memref<!tpu.dma_semaphore, #tpu.memory_space<semaphore_mem>>)
    %c0_i32_0 = arith.constant 0 : i32
    %2 = tpu.memref_slice %arg2[%c0_i32_0] : memref<1x!tpu.dma_semaphore, #tpu.memory_space<semaphore_mem>> -> memref<1x!tpu.dma_semaphore, #tpu.memory_space<semaphore_mem>>
    %3 = tpu.memref_squeeze %2 : memref<1x!tpu.dma_semaphore, #tpu.memory_space<semaphore_mem>> -> memref<!tpu.dma_semaphore, #tpu.memory_space<semaphore_mem>>
    tpu.wait_dma2 semaphore(%3 : memref<!tpu.dma_semaphore, #tpu.memory_space<semaphore_mem>>) src(%arg0 : memref<256x256xf32, #tpu.memory_space<any>>) dst(%arg1 : memref<256x256xf32, #tpu.memory_space<any>>)
    return
  }
}

</mosaic_0001>

<bundles_post_ra>
// kernel: tpu_custom_call.1
= control target key start
LH: loop header
LB: loop body
LE: loop exit
PB: predicated region body
PF: predicated region fallthrough
CT: control target
= control target key end

     0   :  { %s35_s6 = smov [#allocation2]   ;;  %s36_s7 = smov [#allocation3]   ;;  %s54_s0 = inlined_call_operand.hbm [shape: f32[256,256], index: 0, kind: input, shape index: {}]   ;;  %s55_s1 = inlined_call_operand.hbm [shape: f32[256,256], index: 1, kind: output, shape index: {}]  }
   0x1   :  { %s37_s8 = smov 0  }
   0x2   :  { %18 = dma.general %s54_s0, 8192, %s55_s1, %s35_s6, %s36_s7, [#allocation4], %s37_s8, 0  }
   0x3   :  { %33 = dma.done.wait [#allocation2], 8192 }
   0x4   :  { %34 = vsyncadd [#allocation2], 4294959104 }
   0x5   :  { %23 = vsyncmov [#allocation2] }
   0x8   :  { %s24_s13 = vpop.sfrf %23 }
   0x9   :  { %p29_p0 = scmp.ne.s32.totalorder %s24_s13, 0 }
   0xb   :  { %28 = shalt.err (%p29_p0)  }

</bundles_post_ra>
